<compile_context>
chip_gen: v7x
topology: tpu7x:2x2x1
jax: 0.10.0
libtpu: 0.0.40
codegen_flags: <defaults>
</compile_context>

<pallas_src>
import functools
import math

import jax
import jax.numpy as jnp
from jax.experimental import pallas as pl
from jax.experimental.pallas import tpu as pltpu


def _attn_dropout_kernel(x1_ref, x2_ref, o_ref, *, scale, dropout_p, salt):
    tb, s, _ = x1_ref.shape

    q = x1_ref[...]                      # (TB, S, D) f32
    k = x2_ref[...]                      # (TB, S, D) f32

    # --- scaled QK^T (contract last dims; no explicit transpose) ----------
    qk = jnp.einsum("bqd,bkd->bqk", q, k,
                    preferred_element_type=jnp.float32) * scale   # (TB,S,S)

    # --- softmax over the last dim ----------------------------------------
    m = jnp.max(qk, axis=-1, keepdims=True)
    e = jnp.exp(qk - m)
    denom = jnp.sum(e, axis=-1, keepdims=True)
    # fold the dropout 1/(1-p) rescale into the softmax normalization
    inv = (1.0 / (1.0 - dropout_p)) / denom                       # (TB,S,1)

    # --- dropout keep-mask: counter-based hash, integer-domain compare ----
    blk = pl.program_id(0)
    shape = (tb, s, s)
    i0 = jax.lax.broadcasted_iota(jnp.int32, shape, 0)
    i1 = jax.lax.broadcasted_iota(jnp.int32, shape, 1)
    i2 = jax.lax.broadcasted_iota(jnp.int32, shape, 2)
    ctr = ((blk * tb + i0) * s + i1) * s + i2                     # global idx
    x = ctr.astype(jnp.uint32) + jnp.uint32(salt)
    # lowbias32 finalizer
    x = x ^ (x >> 16)
    x = x * jnp.uint32(0x7FEB352D)
    x = x ^ (x >> 15)
    x = x * jnp.uint32(0x846CA68B)
    x = x ^ (x >> 16)
    threshold = jnp.uint32(min(int(dropout_p * 4294967296.0), 0xFFFFFFFF))
    keep = x >= threshold

    p_drop = jnp.where(keep, e * inv, jnp.float32(0.0))           # (TB,S,S)

    # --- attention output ---------------------------------------------------
    out = jnp.einsum("bqk,bkd->bqd", p_drop, k,
                     preferred_element_type=jnp.float32)          # (TB,S,D)
    o_ref[...] = out.astype(o_ref.dtype)


def _choose_block(B, max_tb):
    """Pick a batch tile. Prefer a divisor of B; otherwise pad B up."""
    tb = min(max_tb, B)
    for cand in range(tb, max(tb // 2, 1) - 1, -1):
        if B % cand == 0:
            return cand, B
    padded = -(-B // tb) * tb
    return tb, padded


def model_forward(x1, x2, *, dropout_p=0.1, seed=0, max_tb=256):
    """Pallas implementation of Model.forward (training-mode dropout)."""
    assert x1.shape == x2.shape and x1.ndim == 3
    B, S, D = x1.shape
    scale = 1.0 / math.sqrt(D)           # config.d_model == last dim

    tb, Bp = _choose_block(B, max_tb)
    x1 = x1.astype(jnp.float32)
    x2 = x2.astype(jnp.float32)
    if Bp != B:
        pad = Bp - B
        x1 = jnp.concatenate([x1, jnp.zeros((pad, S, D), x1.dtype)], axis=0)
        x2 = jnp.concatenate([x2, jnp.zeros((pad, S, D), x2.dtype)], axis=0)

    # TODO(synk): dropout mask is a deterministic function of (seed, element
    # index); PyTorch's stateful RNG stream is not reproduced.
    salt = (int(seed) * 0x9E3779B9) & 0xFFFFFFFF
    kernel = functools.partial(
        _attn_dropout_kernel,
        scale=scale,
        dropout_p=float(dropout_p),
        salt=salt,
    )

    out = pl.pallas_call(
        kernel,
        out_shape=jax.ShapeDtypeStruct((Bp, S, D), jnp.float32),
        grid_spec=pltpu.PrefetchScalarGridSpec(
            num_scalar_prefetch=0,
            grid=(Bp // tb,),
            in_specs=[
                pl.BlockSpec((tb, S, D), lambda i: (i, 0, 0)),
                pl.BlockSpec((tb, S, D), lambda i: (i, 0, 0)),
            ],
            out_specs=pl.BlockSpec((tb, S, D), lambda i: (i, 0, 0)),
        ),
        compiler_params=pltpu.CompilerParams(
            dimension_semantics=("parallel",),
            vmem_limit_bytes=48 * 1024 * 1024,
        ),
    )(x1, x2)

    return out[:B] if Bp != B else out


def _reference_no_dropout(x1, x2):
    scale = 1.0 / math.sqrt(x1.shape[-1])
    qk = jnp.einsum("bqd,bkd->bqk", x1, x2) * scale
    p = jax.nn.softmax(qk, axis=-1)
    return jnp.einsum("bqk,bkd->bqd", p, x2)


if __name__ == "__main__":
    # Module uses (2052, 12, 128); keep seq/d_model, use a small batch.
    B, S, D = 8, 12, 128
    key = jax.random.PRNGKey(0)
    k1, k2 = jax.random.split(key)
    x1 = jax.random.normal(k1, (B, S, D), dtype=jnp.float32)
    x2 = jax.random.normal(k2, (B, S, D), dtype=jnp.float32)

    # Correctness check on the deterministic path (dropout disabled).
    out_nodrop = model_forward(x1, x2, dropout_p=0.0, seed=0)
    jax.block_until_ready(out_nodrop)
    ref = _reference_no_dropout(x1, x2)
    assert bool(jnp.allclose(out_nodrop, ref, rtol=1e-3, atol=1e-3)), \
        "kernel (dropout disabled) does not match reference"

    # Forward pass matching the PyTorch module (training-mode dropout p=0.1).
    out = model_forward(x1, x2, dropout_p=0.1, seed=0)
    jax.block_until_ready(out)
    assert out.shape == (B, S, D) and out.dtype == jnp.float32
    assert bool(jnp.all(jnp.isfinite(out)))
    print("KERNEL_OK")
</pallas_src>

<mosaic_0001>
module attributes {stable_mosaic.version = 11 : i64} {
  func.func @_attn_dropout_kernel(%arg0: i32, %arg1: memref<8x12x128xf32, #tpu.memory_space<vmem>>, %arg2: memref<8x12x128xf32, #tpu.memory_space<vmem>>, %arg3: memref<8x12x128xf32, #tpu.memory_space<vmem>>) attributes {dimension_semantics = [#tpu.dimension_semantics<parallel>], iteration_bounds = array<i64: 1>, scalar_prefetch = 0 : i64, scratch_operands = 0 : i64, tpu.core_type = #tpu.core_type<tc>, window_params = [{transform_indices = @transform_0, window_bounds = array<i64: 8, 12, 128>}, {transform_indices = @transform_1, window_bounds = array<i64: 8, 12, 128>}, {transform_indices = @transform_2, window_bounds = array<i64: 8, 12, 128>}]} {
    %c0 = arith.constant 0 : index
    %c0_0 = arith.constant 0 : index
    %c0_1 = arith.constant 0 : index
    %0 = vector.load %arg1[%c0, %c0_0, %c0_1] : memref<8x12x128xf32, #tpu.memory_space<vmem>>, vector<8x12x128xf32>
    %c0_2 = arith.constant 0 : index
    %c0_3 = arith.constant 0 : index
    %c0_4 = arith.constant 0 : index
    %1 = vector.load %arg2[%c0_2, %c0_3, %c0_4] : memref<8x12x128xf32, #tpu.memory_space<vmem>>, vector<8x12x128xf32>
    "tpu.trace_start"() <{level = 10 : i32, message = "bqd,bkd->bqk"}> : () -> ()
    %cst = arith.constant dense<0.000000e+00> : vector<8x12x12xf32>
    %2 = tpu.matmul %0, %1, %cst {dimension_numbers = #tpu.dot_dimension_numbers<[2], [2], [1], [1], [0, 0, 0, 1, 1, 1], [0], [0]>} : vector<8x12x128xf32>, vector<8x12x128xf32>, vector<8x12x12xf32> -> vector<8x12x12xf32>
    "tpu.trace_stop"() : () -> ()
    %cst_5 = arith.constant 0.0883883461 : f32
    %3 = vector.broadcast %cst_5 : f32 to vector<8x12x12xf32>
    %4 = arith.mulf %2, %3 : vector<8x12x12xf32>
    %cst_6 = arith.constant dense<0xFF800000> : vector<8x12xf32>
    %5 = vector.multi_reduction <maximumf>, %4, %cst_6 [2] : vector<8x12x12xf32> to vector<8x12xf32>
    %6 = vector.shape_cast %5 : vector<8x12xf32> to vector<8x12x1xf32>
    %7 = vector.broadcast %6 : vector<8x12x1xf32> to vector<8x12x12xf32>
    %8 = arith.subf %4, %7 : vector<8x12x12xf32>
    %9 = math.exp %8 : vector<8x12x12xf32>
    %cst_7 = arith.constant dense<0.000000e+00> : vector<8x12xf32>
    %10 = vector.multi_reduction <add>, %9, %cst_7 [2] : vector<8x12x12xf32> to vector<8x12xf32>
    %11 = vector.shape_cast %10 : vector<8x12xf32> to vector<8x12x1xf32>
    %cst_8 = arith.constant 1.000000e+00 : f32
    %12 = vector.broadcast %cst_8 : f32 to vector<8x12x1xf32>
    %13 = arith.divf %12, %11 : vector<8x12x1xf32>
    %14 = tpu.iota {dimensions = array<i32: 0>} : vector<8x12x12xi32>
    %15 = tpu.iota {dimensions = array<i32: 1>} : vector<8x12x12xi32>
    %16 = tpu.iota {dimensions = array<i32: 2>} : vector<8x12x12xi32>
    %c8_i32 = arith.constant 8 : i32
    %17 = arith.muli %arg0, %c8_i32 : i32
    %18 = vector.broadcast %17 : i32 to vector<8x12x12xi32>
    %19 = arith.addi %18, %14 : vector<8x12x12xi32>
    %c12_i32 = arith.constant 12 : i32
    %20 = vector.broadcast %c12_i32 : i32 to vector<8x12x12xi32>
    %21 = arith.muli %19, %20 : vector<8x12x12xi32>
    %22 = arith.addi %21, %15 : vector<8x12x12xi32>
    %c12_i32_9 = arith.constant 12 : i32
    %23 = vector.broadcast %c12_i32_9 : i32 to vector<8x12x12xi32>
    %24 = arith.muli %22, %23 : vector<8x12x12xi32>
    %25 = arith.addi %24, %16 : vector<8x12x12xi32>
    %c0_i32 = arith.constant 0 : i32
    %26 = vector.broadcast %c0_i32 : i32 to vector<8x12x12xi32>
    %27 = arith.addi %25, %26 : vector<8x12x12xi32>
    %c16_i32 = arith.constant 16 : i32
    %28 = vector.broadcast %c16_i32 : i32 to vector<8x12x12xi32>
    %29 = arith.shrui %27, %28 : vector<8x12x12xi32>
    %30 = arith.xori %27, %29 : vector<8x12x12xi32>
    %c2146121005_i32 = arith.constant 2146121005 : i32
    %31 = vector.broadcast %c2146121005_i32 : i32 to vector<8x12x12xi32>
    %32 = arith.muli %30, %31 : vector<8x12x12xi32>
    %c15_i32 = arith.constant 15 : i32
    %33 = vector.broadcast %c15_i32 : i32 to vector<8x12x12xi32>
    %34 = arith.shrui %32, %33 : vector<8x12x12xi32>
    %35 = arith.xori %32, %34 : vector<8x12x12xi32>
    %c-2073254261_i32 = arith.constant -2073254261 : i32
    %36 = vector.broadcast %c-2073254261_i32 : i32 to vector<8x12x12xi32>
    %37 = arith.muli %35, %36 : vector<8x12x12xi32>
    %c16_i32_10 = arith.constant 16 : i32
    %38 = vector.broadcast %c16_i32_10 : i32 to vector<8x12x12xi32>
    %39 = arith.shrui %37, %38 : vector<8x12x12xi32>
    %40 = arith.xori %37, %39 : vector<8x12x12xi32>
    %c0_i32_11 = arith.constant 0 : i32
    %41 = vector.broadcast %c0_i32_11 : i32 to vector<8x12x12xi32>
    %42 = arith.cmpi uge, %40, %41 : vector<8x12x12xi32>
    %43 = vector.broadcast %13 : vector<8x12x1xf32> to vector<8x12x12xf32>
    %44 = arith.mulf %9, %43 : vector<8x12x12xf32>
    %cst_12 = arith.constant 0.000000e+00 : f32
    %45 = vector.broadcast %cst_12 : f32 to vector<8x12x12xf32>
    %46 = arith.select %42, %44, %45 : vector<8x12x12xi1>, vector<8x12x12xf32>
    "tpu.trace_start"() <{level = 10 : i32, message = "bqk,bkd->bqd"}> : () -> ()
    %cst_13 = arith.constant dense<0.000000e+00> : vector<8x12x128xf32>
    %47 = tpu.matmul %46, %1, %cst_13 {dimension_numbers = #tpu.dot_dimension_numbers<[2], [1], [1], [2], [0, 0, 0, 1, 1, 2], [0], [0]>} : vector<8x12x12xf32>, vector<8x12x128xf32>, vector<8x12x128xf32> -> vector<8x12x128xf32>
    "tpu.trace_stop"() : () -> ()
    %c0_14 = arith.constant 0 : index
    %c0_15 = arith.constant 0 : index
    %c0_16 = arith.constant 0 : index
    %48 = vector.load %arg3[%c0_14, %c0_15, %c0_16] : memref<8x12x128xf32, #tpu.memory_space<vmem>>, vector<8x12x128xf32>
    tpu.vector_store %arg3[%c0_14, %c0_15, %c0_16], %47 {strides = array<i32>} : memref<8x12x128xf32, #tpu.memory_space<vmem>>, vector<8x12x128xf32>,
    return
  }
  func.func @transform_0(%arg0: i32) -> (i32, i32, i32) {
    %c0_i32 = arith.constant 0 : i32
    %c0_i32_0 = arith.constant 0 : i32
    %c0_i32_1 = arith.constant 0 : i32
    return %arg0, %c0_i32, %c0_i32_0 : i32, i32, i32
  }
  func.func @transform_1(%arg0: i32) -> (i32, i32, i32) {
    %c0_i32 = arith.constant 0 : i32
    %c0_i32_0 = arith.constant 0 : i32
    %c0_i32_1 = arith.constant 0 : i32
    return %arg0, %c0_i32, %c0_i32_0 : i32, i32, i32
  }
  func.func @transform_2(%arg0: i32) -> (i32, i32, i32) {
    %c0_i32 = arith.constant 0 : i32
    %c0_i32_0 = arith.constant 0 : i32
    %c0_i32_1 = arith.constant 0 : i32
    return %arg0, %c0_i32, %c0_i32_0 : i32, i32, i32
  }
}

</mosaic_0001>

<bundles_post_ra>
// kernel: tpu_custom_call.1
= control target key start
LH: loop header
LB: loop body
LE: loop exit
PB: predicated region body
PF: predicated region fallthrough
CT: control target
= control target key end

     0   :  { %vm663_vm0 = vcmask 93184   ;;  %vm659_vm1 = vcmask 97280   ;;  %vm1089_vm2 = vcmask 1043456   ;;  %vm2121_vm3 = vmmov 1   ;;  %s2647_s1 = inlined_call_operand.vmem [shape: f32[8,12,128], index: 1, kind: input, shape index: {}]   ;;  %s2648_s0 = inlined_call_operand.vmem [shape: f32[8,12,128], index: 0, kind: input, shape index: {}]   ;;  %s2649_s2 = inlined_call_operand.vmem [shape: f32[8,12,128], index: 2, kind: output, shape index: {}]  }
   0x1   :  { %v27_v0 = vld [vmem:[%s2647_s1] sm:$0xff]  ;;  %v28_v1 = vld [vmem:[%s2647_s1 + $0x8] sm:$0xf]  ;;  %v29_v2 = vld [vmem:[%s2647_s1 + $0x10] sm:$0xff] }
   0x2   :  { %v2146_v3 = vpack.c.bf16 %v28_v1, %v27_v0  ;;  %v30_v4 = vld [vmem:[%s2647_s1 + $0x18] sm:$0xf]  ;;  %v11_v5 = vld [vmem:[%s2648_s0] sm:$0xff]  ;;  %v13_v7 = vld [vmem:[%s2648_s0 + $0x10] sm:$0xff] }
   0x3   :  { %v2154_v6 = vpack.c.bf16 %v30_v4, %v29_v2  ;;  %1868 = vmatprep.mubr.f32.mxu0 %v11_v5  ;;  %v31_v8 = vld [vmem:[%s2647_s1 + $0x20] sm:$0xff]  ;;  %v32_v9 = vld [vmem:[%s2647_s1 + $0x28] sm:$0xf]  ;;  %1875 = vmatprep.mubr.f32.mxu1 %v13_v7  ;;  %v33_v11 = vld [vmem:[%s2647_s1 + $0x30] sm:$0xff] }
   0x4   :  { %1977 = vmatprep.subr.bf16.mxu0 %v2146_v3  ;;  %v2166_v10 = vpack.c.bf16 %v32_v9, %v31_v8  ;;  %v34_v12 = vld [vmem:[%s2647_s1 + $0x38] sm:$0xf]  ;;  %v35_v14 = vld [vmem:[%s2647_s1 + $0x40] sm:$0xff]  ;;  %v36_v15 = vld [vmem:[%s2647_s1 + $0x48] sm:$0xf] }
   0x5   :  { %1981 = vmatprep.subr.bf16.mxu1 %v2154_v6  ;;  %1979 = vmatpush3.bf16.xpose.msra.mxu0 %v2146_v3  ;;  %v2176_v13 = vpack.c.bf16 %v34_v12, %v33_v11  ;;  %v12_v16 = vld [vmem:[%s2648_s0 + $0x8] sm:$0xf]  ;;  %v37_v17 = vld [vmem:[%s2647_s1 + $0x50] sm:$0xff]  ;;  %v38_v18 = vld [vmem:[%s2647_s1 + $0x58] sm:$0xf]  ;;  %v2202_v21 = vpack.c.bf16 %v36_v15, %v35_v14 }
   0x6   :  { %1983 = vmatpush3.bf16.xpose.msra.mxu1 %v2154_v6  ;;  %1985 = vmatprep.subr.bf16.mxu0 %v2166_v10  ;;  %v14_v19 = vld [vmem:[%s2648_s0 + $0x18] sm:$0xf]  ;;  %v17_v20 = vld [vmem:[%s2648_s0 + $0x30] sm:$0xff]  ;;  %v15_v22 = vld [vmem:[%s2648_s0 + $0x20] sm:$0xff]  ;;  %v2207_v23 = vpack.c.bf16 %v38_v18, %v37_v17 }
   0x7   :  { %1989 = vmatprep.subr.bf16.mxu1 %v2176_v13  ;;  %v39_v24 = vld [vmem:[%s2647_s1 + $0x60] sm:$0xff]  ;;  %v40_v25 = vld [vmem:[%s2647_s1 + $0x68] sm:$0xf]  ;;  %v41_v27 = vld [vmem:[%s2647_s1 + $0x70] sm:$0xff] }
   0x8   :  { %v16_v26 = vld [vmem:[%s2648_s0 + $0x28] sm:$0xf]  ;;  %v42_v28 = vld [vmem:[%s2647_s1 + $0x78] sm:$0xf]  ;;  %v21_v30 = vld [vmem:[%s2648_s0 + $0x50] sm:$0xff]  ;;  %v2234_v31 = vpack.c.bf16 %v40_v25, %v39_v24 }
   0x9   :  { %v18_v29 = vld [vmem:[%s2648_s0 + $0x38] sm:$0xf]  ;;  %v19_v32 = vld [vmem:[%s2648_s0 + $0x40] sm:$0xff]  ;;  %v2239_v33 = vpack.c.bf16 %v42_v28, %v41_v27  ;;  %v20_v34 = vld [vmem:[%s2648_s0 + $0x48] sm:$0xf] }
   0xa   :  { %v22_v35 = vld [vmem:[%s2648_s0 + $0x58] sm:$0xf]  ;;  %v23_v36 = vld [vmem:[%s2648_s0 + $0x60] sm:$0xff]  ;;  %v25_v37 = vld [vmem:[%s2648_s0 + $0x70] sm:$0xff] }
   0xb   :  { %v24_v38 = vld [vmem:[%s2648_s0 + $0x68] sm:$0xf]  ;;  %v26_v39 = vld [vmem:[%s2648_s0 + $0x78] sm:$0xf]  ;;  %vm2407_vm4 = vmpackc.low %vm1089_vm2, %vm2121_vm3 }
   0xc   :  { %1869 = vmatmul.mubr.f32.vlgmr.msra.gmra.mrb[0].mxu0 %v12_v16 }
   0xd   :  { %1876 = vmatmul.mubr.f32.vlgmr.msra.gmra.mrb[0].mxu1 %v14_v19  ;;  %1987 = vmatpush3.bf16.xpose.msra.mxu0 %v2166_v10 }
   0xe   :  { %1991 = vmatpush3.bf16.xpose.msra.mxu1 %v2176_v13  ;;  %1889 = vmatprep.mubr.f32.mxu1 %v17_v20 }
   0xf   :  { %1882 = vmatprep.mubr.f32.mxu0 %v15_v22  ;;  %1993 = vmatprep.subr.bf16.mxu0 %v2202_v21 }
  0x10   :  { %1997 = vmatprep.subr.bf16.mxu1 %v2207_v23 }
  0x14   :  { %1883 = vmatmul.mubr.f32.vlgmr.msra.gmra.mrb[2].mxu0 %v16_v26 }
  0x15   :  { %1890 = vmatmul.mubr.f32.vlgmr.msra.gmra.mrb[2].mxu1 %v18_v29  ;;  %1995 = vmatpush3.bf16.xpose.msra.mxu0 %v2202_v21 }
  0x16   :  { %1999 = vmatpush3.bf16.xpose.msra.mxu1 %v2207_v23  ;;  %1903 = vmatprep.mubr.f32.mxu1 %v21_v30 }
  0x17   :  { %1896 = vmatprep.mubr.f32.mxu0 %v19_v32  ;;  %2001 = vmatprep.subr.bf16.mxu0 %v2234_v31 }
  0x18   :  { %2005 = vmatprep.subr.bf16.mxu1 %v2239_v33 }
  0x1c   :  { %1897 = vmatmul.mubr.f32.vlgmr.msra.gmra.mrb[4].mxu0 %v20_v34 }
  0x1d   :  { %1904 = vmatmul.mubr.f32.vlgmr.msra.gmra.mrb[4].mxu1 %v22_v35  ;;  %2003 = vmatpush3.bf16.xpose.msra.mxu0 %v2234_v31 }
  0x1e   :  { %2007 = vmatpush3.bf16.xpose.msra.mxu1 %v2239_v33  ;;  %1910 = vmatprep.mubr.f32.mxu0 %v23_v36 }
  0x1f   :  { %1917 = vmatprep.mubr.f32.mxu1 %v25_v37  ;;  %2010 = vmatprep.subr.msk.bf16.mxu0 %vm2407_vm4, %v2146_v3 }
  0x20   :  { %2016 = vmatprep.subr.msk.bf16.mxu1 %vm2407_vm4, %v2154_v6 }
  0x24   :  { %1911 = vmatmul.mubr.f32.vlgmr.msra.gmra.mrb[6].mxu0 %v24_v38 }
  0x25   :  { %1918 = vmatmul.mubr.f32.vlgmr.msra.gmra.mrb[6].mxu1 %v26_v39  ;;  %2013 = vmatpush3.bf16.msk.msra.mxu0 %vm2407_vm4, %v2146_v3 }
  0x26   :  { %2019 = vmatpush3.bf16.msk.msra.mxu1 %vm2407_vm4, %v2154_v6  ;;  %2022 = vmatprep.subr.msk.bf16.mxu0 %vm2407_vm4, %v2166_v10 }
  0x27   :  { %2028 = vmatprep.subr.msk.bf16.mxu1 %vm2407_vm4, %v2176_v13 }
  0xdf   :  { %v1870_v40 = vpop.f32.mrb[0].mxu0 }
  0xe0   :  { %v2265_v41 = vmul.f32 0.088388346, %v1870_v40  ;;  %v109_v42 = vpop.f32.mrb[1].mxu0  ;;  %v1877_v43 = vpop.f32.mrb[0].mxu1 }
  0xe1   :  { %v2267_v44 = vmul.f32 0.088388346, %v109_v42  ;;  %v2269_v45 = vmul.f32 0.088388346, %v1877_v43  ;;  %v184_v46 = vpop.f32.mrb[1].mxu1 }
  0xe2   :  { %v2271_v47 = vmul.f32 0.088388346, %v184_v46  ;;  %v664_v48 = vsel %vm663_vm0, %v2265_v41, -inf }
  0xe3   :  { %665 = vmax.xlane.f32.xlu1 %v664_v48  ;;  %v660_v49 = vsel %vm659_vm1, %v2267_v44, -inf  ;;  %v670_v50 = vsel %vm663_vm0, %v2269_v45, -inf }
  0xe4   :  { %661 = vmax.xlane.f32.xlu0 %v660_v49  ;;  %v667_v51 = vsel %vm659_vm1, %v2271_v47, -inf }
  0xe7   :  { %671 = vmax.xlane.f32.xlu1 %v670_v50  ;;  %v1884_v52 = vpop.f32.mrb[2].mxu0 }
  0xe8   :  { %v1891_v53 = vpop.f32.mrb[2].mxu1  ;;  %668 = vmax.xlane.f32.xlu0 %v667_v51  ;;  %v2281_v54 = vmul.f32 0.088388346, %v1884_v52  ;;  %v259_v55 = vpop.f32.mrb[3].mxu0 }
  0xe9   :  { %v2283_v56 = vmul.f32 0.088388346, %v1891_v53  ;;  %v334_v57 = vpop.f32.mrb[3].mxu1  ;;  %v2285_v58 = vmul.f32 0.088388346, %v259_v55 }
  0xea   :  { %v2287_v59 = vmul.f32 0.088388346, %v334_v57  ;;  %v676_v60 = vsel %vm663_vm0, %v2281_v54, -inf }
  0xeb   :  { %v682_v61 = vsel %vm663_vm0, %v2283_v56, -inf  ;;  %v673_v63 = vsel %vm659_vm1, %v2285_v58, -inf }
  0xec   :  { %683 = vmax.xlane.f32.xlu1 %v682_v61  ;;  %677 = vmax.xlane.f32.xlu0 %v676_v60  ;;  %v679_v62 = vsel %vm659_vm1, %v2287_v59, -inf }
  0xef   :  { %v1898_v0 = vpop.f32.mrb[4].mxu0 }
  0xf0   :  { %v1905_v1 = vpop.f32.mrb[4].mxu1  ;;  %680 = vmax.xlane.f32.xlu1 %v679_v62  ;;  %674 = vmax.xlane.f32.xlu0 %v673_v63  ;;  %v2297_v2 = vmul.f32 0.088388346, %v1898_v0  ;;  %v409_v4 = vpop.f32.mrb[5].mxu0 }
  0xf1   :  { %v2299_v5 = vmul.f32 0.088388346, %v1905_v1  ;;  %v484_v7 = vpop.f32.mrb[5].mxu1  ;;  %v2301_v8 = vmul.f32 0.088388346, %v409_v4 }
  0xf2   :  { %v2303_v9 = vmul.f32 0.088388346, %v484_v7  ;;  %v688_v11 = vsel %vm663_vm0, %v2297_v2, -inf }
  0xf3   :  { %v694_v12 = vsel %vm663_vm0, %v2299_v5, -inf  ;;  %v685_v15 = vsel %vm659_vm1, %v2301_v8, -inf }
  0xf4   :  { %695 = vmax.xlane.f32.xlu1 %v694_v12  ;;  %689 = vmax.xlane.f32.xlu0 %v688_v11  ;;  %v691_v14 = vsel %vm659_vm1, %v2303_v9, -inf }
  0xf7   :  { %v1912_v16 = vpop.f32.mrb[6].mxu0 }
  0xf8   :  { %v1919_v17 = vpop.f32.mrb[6].mxu1  ;;  %692 = vmax.xlane.f32.xlu1 %v691_v14  ;;  %686 = vmax.xlane.f32.xlu0 %v685_v15  ;;  %v559_v18 = vpop.f32.mrb[7].mxu0  ;;  %v2317_v24 = vmul.f32 0.088388346, %v1912_v16 }
  0xf9   :  { %v634_v19 = vpop.f32.mrb[7].mxu1  ;;  %v2313_v20 = vmul.f32 0.088388346, %v559_v18  ;;  %v2321_v26 = vmul.f32 0.088388346, %v1919_v17 }
  0xfa   :  { %v2315_v22 = vmul.f32 0.088388346, %v634_v19  ;;  %v700_v28 = vsel %vm663_vm0, %v2317_v24, -inf }
  0xfb   :  { %v697_v25 = vsel %vm659_vm1, %v2313_v20, -inf  ;;  %v706_v29 = vsel %vm663_vm0, %v2321_v26, -inf }
  0xfc   :  { %v703_v27 = vsel %vm659_vm1, %v2315_v22, -inf  ;;  %698 = vmax.xlane.f32.xlu0 %v697_v25 }
  0xfd   :  { %704 = vmax.xlane.f32.xlu1 %v703_v27 }
 0x100   :  { %701 = vmax.xlane.f32.xlu0 %v700_v28 }
 0x101   :  { %707 = vmax.xlane.f32.xlu1 %v706_v29 }
 0x170   :  { %v666_v30 = vpop.xlane.xlu1 %665 }
 0x171   :  { %v710_v32 = vsub.f32 %v2265_v41, %v666_v30  ;;  %v662_v34 = vpop.xlane.xlu0 %661 }
 0x172   :  { %v709_v35 = vsub.f32 %v2267_v44, %v662_v34 }
 0x173   :  { %v727_v36 = vmul.f32 1.442695, %v710_v32 }
 0x174   :  { %v725_v37 = vmul.f32 1.442695, %v709_v35  ;;  %v672_v38 = vpop.xlane.xlu1 %671 }
 0x175   :  { %2057 = vpow2.f32 %v727_v36  ;;  %v712_v39 = vsub.f32 %v2269_v45, %v672_v38  ;;  %v669_v40 = vpop.xlane.xlu0 %668 }
 0x176   :  { %v711_v42 = vsub.f32 %v2271_v47, %v669_v40  ;;  %2059 = vpow2.f32 %v725_v37 }
 0x177   :  { %v731_v43 = vmul.f32 1.442695, %v712_v39 }
 0x178   :  { %v729_v46 = vmul.f32 1.442695, %v711_v42 }
 0x179   :  { %2061 = vpow2.f32 %v731_v43  ;;  %v684_v48 = vpop.xlane.xlu1 %683  ;;  %v678_v49 = vpop.xlane.xlu0 %677 }
 0x17a   :  { %v716_v41 = vsub.f32 %v2283_v56, %v684_v48  ;;  %v714_v50 = vsub.f32 %v2281_v54, %v678_v49  ;;  %2063 = vpow2.f32 %v729_v46 }
 0x17c   :  { %v739_v44 = vmul.f32 1.442695, %v716_v41  ;;  %v735_v51 = vmul.f32 1.442695, %v714_v50 }
 0x17d   :  { %v681_v52 = vpop.xlane.xlu1 %680  ;;  %v675_v53 = vpop.xlane.xlu0 %674 }
 0x17e   :  { %2065 = vpow2.f32 %v739_v44  ;;  %v715_v45 = vsub.f32 %v2287_v59, %v681_v52  ;;  %v713_v47 = vsub.f32 %v2285_v58, %v675_v53 }
 0x17f   :  { %v2337_v55 = vpop.eup %2057  ;;  %2067 = vpow2.f32 %v735_v51 }
 0x180   :  { %v737_v57 = vmul.f32 1.442695, %v715_v45  ;;  %v733_v60 = vmul.f32 1.442695, %v713_v47  ;;  %v760_v56 = vsel %vm663_vm0, %v2337_v55, 0.0  ;;  %v2341_v61 = vpop.eup %2059 }
 0x181   :  { %v696_v54 = vpop.xlane.xlu1 %695  ;;  %v690_v62 = vpop.xlane.xlu0 %689  ;;  %761 = vadd.xlane.f32.xlu0 %v760_v56  ;;  %v757_v7 = vsel %vm659_vm1, %v2341_v61, 0.0 }
 0x182   :  { %2069 = vpow2.f32 %v737_v57  ;;  %v720_v63 = vsub.f32 %v2299_v5, %v696_v54  ;;  %v718_v59 = vsub.f32 %v2297_v2, %v690_v62  ;;  %v837_v54 = vlaneseq }
 0x183   :  { %v2345_v0 = vpop.eup %2061  ;;  %2071 = vpow2.f32 %v733_v60 }
 0x184   :  { %v747_v58 = vmul.f32 1.442695, %v720_v63  ;;  %v743_v1 = vmul.f32 1.442695, %v718_v59  ;;  %v766_v4 = vsel %vm663_vm0, %v2345_v0, 0.0  ;;  %v2351_v11 = vpop.eup %2063  ;;  %v2431_v62 = vshrl.u32 %v837_v54, 7 }
 0x185   :  { %v693_v12 = vpop.xlane.xlu1 %692  ;;  %767 = vadd.xlane.f32.xlu1 %v766_v4  ;;  %v687_v14 = vpop.xlane.xlu0 %686  ;;  %758 = vadd.xlane.f32.xlu0 %v757_v7  ;;  %v763_v18 = vsel %vm659_vm1, %v2351_v11, 0.0  ;;  %v2436_v63 = vand.u32 127, %v837_v54 }
 0x186   :  { %2073 = vpow2.f32 %v747_v58  ;;  %v719_v2 = vsub.f32 %v2303_v9, %v693_v12  ;;  %v717_v5 = vsub.f32 %v2301_v8, %v687_v14  ;;  %v2434_v3 = vadd.s32 8, %v2431_v62 }
 0x187   :  { %2075 = vpow2.f32 %v743_v1  ;;  %v875_v6 = vmul.u32 12, %v2431_v62  ;;  %v861_v4 = vadd.s32 12, %v2431_v62 }
 0x188   :  { %v2355_v15 = vpop.eup %2065  ;;  %v745_v16 = vmul.f32 1.442695, %v719_v2  ;;  %v741_v17 = vmul.f32 1.442695, %v717_v5  ;;  %v876_v59 = vmul.u32 12, %v2434_v3  ;;  %v862_v58 = vadd.s32 12, %v2434_v3 }
 0x189   :  { %v2359_v19 = vpop.eup %2067  ;;  %764 = vadd.xlane.f32.xlu1 %v763_v18  ;;  %v699_v25 = vpop.xlane.xlu0 %698  ;;  %v778_v32 = vsel %vm663_vm0, %v2355_v15, 0.0  ;;  %v891_v7 = vadd.s32 %v875_v6, %v2436_v63  ;;  %v877_v2 = vmul.u32 12, %v861_v4  ;;  %v864_v18 = vadd.s32 24, %v2434_v3 }
 0x18a   :  { %2077 = vpow2.f32 %v745_v16  ;;  %v705_v27 = vpop.xlane.xlu1 %704  ;;  %v721_v28 = vsub.f32 %v2313_v20, %v699_v25  ;;  %v772_v9 = vsel %vm663_vm0, %v2359_v19, 0.0  ;;  %v892_v1 = vadd.s32 %v876_v59, %v2436_v63 }
 0x18b   :  { %2079 = vpow2.f32 %v741_v17  ;;  %v723_v8 = vsub.f32 %v2315_v22, %v705_v27  ;;  %773 = vadd.xlane.f32.xlu0 %v772_v9  ;;  %v878_v12 = vmul.u32 12, %v862_v58  ;;  %v907_v5 = vshrl.u32 %v891_v7, 16 }
 0x18c   :  { %v2365_v29 = vpop.eup %2069  ;;  %v749_v30 = vmul.f32 1.442695, %v721_v28  ;;  %v908_v14 = vshrl.u32 %v892_v1, 16  ;;  %v893_v25 = vadd.s32 %v877_v2, %v2436_v63  ;;  %v863_v27 = vadd.s32 24, %v2431_v62 }
 0x18d   :  { %v2369_v34 = vpop.eup %2071  ;;  %v753_v35 = vmul.f32 1.442695, %v723_v8  ;;  %779 = vadd.xlane.f32.xlu1 %v778_v32  ;;  %v702_v36 = vpop.xlane.xlu0 %701  ;;  %v775_v42 = vsel %vm659_vm1, %v2365_v29, 0.0  ;;  %v894_v16 = vadd.s32 %v878_v12, %v2436_v63  ;;  %v923_v28 = vxor.u32 %v907_v5, %v891_v7 }
 0x18e   :  { %2081 = vpow2.f32 %v749_v30  ;;  %v708_v20 = vpop.xlane.xlu1 %707  ;;  %v722_v37 = vsub.f32 %v2317_v24, %v702_v36  ;;  %v769_v38 = vsel %vm659_vm1, %v2369_v34, 0.0  ;;  %v924_v17 = vxor.u32 %v908_v14, %v892_v1 }
 0x18f   :  { %2083 = vpow2.f32 %v753_v35  ;;  %v724_v22 = vsub.f32 %v2321_v26, %v708_v20  ;;  %770 = vadd.xlane.f32.xlu0 %v769_v38  ;;  %v866_v9 = vadd.s32 36, %v2434_v3  ;;  %v910_v8 = vshrl.u32 %v894_v16, 16 }
 0x190   :  { %v2375_v39 = vpop.eup %2073  ;;  %v751_v40 = vmul.f32 1.442695, %v722_v37  ;;  %v940_v30 = vmul.u32 2146121005, %v924_v17  ;;  %v880_v32 = vmul.u32 12, %v864_v18  ;;  %v909_v35 = vshrl.u32 %v893_v25, 16 }
 0x191   :  { %v2379_v43 = vpop.eup %2075  ;;  %v755_v46 = vmul.f32 1.442695, %v724_v22  ;;  %776 = vadd.xlane.f32.xlu1 %v775_v42  ;;  %v790_v26 = vsel %vm663_vm0, %v2375_v39, 0.0  ;;  %v879_v36 = vmul.u32 12, %v863_v27  ;;  %v865_v20 = vadd.s32 36, %v2431_v62 }
 0x192   :  { %2085 = vpow2.f32 %v751_v40  ;;  %v784_v24 = vsel %vm663_vm0, %v2379_v43, 0.0  ;;  %v939_v37 = vmul.u32 2146121005, %v923_v28  ;;  %v882_v38 = vmul.u32 12, %v866_v9 }
 0x193   :  { %2087 = vpow2.f32 %v755_v46  ;;  %785 = vadd.xlane.f32.xlu0 %v784_v24  ;;  %v926_v22 = vxor.u32 %v910_v8, %v894_v16  ;;  %v956_v40 = vshrl.u32 %v940_v30, 15  ;;  %v896_v42 = vadd.s32 %v880_v32, %v2436_v63 }
 0x194   :  { %v2383_v48 = vpop.eup %2077  ;;  %v925_v46 = vxor.u32 %v909_v35, %v893_v25  ;;  %v895_v24 = vadd.s32 %v879_v36, %v2436_v63  ;;  %v868_v12 = vadd.s32 48, %v2434_v3  ;;  %v869_v14 = vadd.s32 60, %v2431_v62 }
 0x195   :  { %v2387_v49 = vpop.eup %2079  ;;  %791 = vadd.xlane.f32.xlu1 %v790_v26  ;;  %v787_v44 = vsel %vm659_vm1, %v2383_v48, 0.0  ;;  %v881_v26 = vmul.u32 12, %v865_v20  ;;  %v870_v25 = vadd.s32 60, %v2434_v3  ;;  %v871_v9 = vadd.s32 72, %v2431_v62 }
 0x196   :  { %v781_v41 = vsel %vm659_vm1, %v2387_v49, 0.0  ;;  %v941_v54 = vmul.u32 2146121005, %v925_v46  ;;  %v911_v59 = vshrl.u32 %v895_v24, 16  ;;  %v884_v32 = vmul.u32 12, %v868_v12 }
 0x197   :  { %782 = vadd.xlane.f32.xlu0 %v781_v41  ;;  %v955_v41 = vshrl.u32 %v939_v37, 15  ;;  %v897_v6 = vadd.s32 %v881_v26, %v2436_v63  ;;  %v885_v35 = vmul.u32 12, %v869_v14  ;;  %v887_v26 = vmul.u32 12, %v871_v9 }
 0x198   :  { %v2391_v50 = vpop.eup %2081  ;;  %v957_v16 = vshrl.u32 %v941_v54, 15  ;;  %v927_v17 = vxor.u32 %v911_v59, %v895_v24 }
 0x199   :  { %v2395_v51 = vpop.eup %2083  ;;  %788 = vadd.xlane.f32.xlu1 %v787_v44  ;;  %v793_v52 = vsel %vm659_vm1, %v2391_v50, 0.0  ;;  %v898_v44 = vadd.s32 %v882_v38, %v2436_v63  ;;  %v971_v58 = vxor.u32 %v955_v41, %v939_v37  ;;  %v913_v18 = vshrl.u32 %v897_v6, 16 }
 0x19a   :  { %v799_v45 = vsel %vm659_vm1, %v2395_v51, 0.0  ;;  %v873_v37 = vadd.s32 84, %v2431_v62  ;;  %v973_v38 = vxor.u32 %v957_v16, %v941_v54  ;;  %v872_v41 = vadd.s32 72, %v2434_v3 }
 0x19b   :  { %794 = vadd.xlane.f32.xlu0 %v793_v52  ;;  %v942_v52 = vmul.u32 2146121005, %v926_v22  ;;  %v914_v1 = vshrl.u32 %v898_v44, 16  ;;  %v987_v27 = vmul.u32 2221713035, %v971_v58 }
 0x19c   :  { %v2399_v53 = vpop.eup %2085  ;;  %v943_v22 = vmul.u32 2146121005, %v927_v17  ;;  %v889_v58 = vmul.u32 12, %v873_v37 }
 0x19d   :  { %v2403_v47 = vpop.eup %2087  ;;  %800 = vadd.xlane.f32.xlu1 %v799_v45  ;;  %v796_v57 = vsel %vm663_vm0, %v2399_v53, 0.0  ;;  %v867_v45 = vadd.s32 48, %v2431_v62  ;;  %v958_v4 = vshrl.u32 %v942_v52, 15  ;;  %v930_v28 = vxor.u32 %v914_v1, %v898_v44 }
 0x19e   :  { %v802_v56 = vsel %vm663_vm0, %v2403_v47, 0.0  ;;  %v1003_v46 = vshrl.u32 %v987_v27, 16  ;;  %v874_v62 = vadd.s32 84, %v2434_v3  ;;  %v959_v1 = vshrl.u32 %v943_v22, 15 }
 0x19f   :  { %797 = vadd.xlane.f32.xlu0 %v796_v57  ;;  %v972_v57 = vxor.u32 %v956_v40, %v940_v30  ;;  %v883_v7 = vmul.u32 12, %v867_v45  ;;  %v974_v8 = vxor.u32 %v958_v4, %v942_v52  ;;  %v929_v40 = vxor.u32 %v913_v18, %v897_v6 }
 0x1a0   :  { %v946_v24 = vmul.u32 2146121005, %v930_v28  ;;  %v900_v52 = vadd.s32 %v884_v32, %v2436_v63  ;;  %v989_v6 = vmul.u32 2221713035, %v973_v38  ;;  %v2468_v12 = vxor.u32 %v1003_v46, %v987_v27 }
 0x1a1   :  { %803 = vadd.xlane.f32.xlu1 %v802_v56  ;;  %v912_v56 = vshrl.u32 %v896_v42, 16  ;;  %v988_v2 = vmul.u32 2221713035, %v972_v57  ;;  %v899_v30 = vadd.s32 %v883_v7, %v2436_v63  ;;  %v990_v44 = vmul.u32 2221713035, %v974_v8 }
 0x1a2   :  { %v901_v57 = vadd.s32 %v885_v35, %v2436_v63  ;;  %v945_v4 = vmul.u32 2146121005, %v929_v40  ;;  %v962_v14 = vshrl.u32 %v946_v24, 15  ;;  %v888_v16 = vmul.u32 12, %v872_v41 }
 0x1a3   :  { %v928_v5 = vxor.u32 %v912_v56, %v896_v42  ;;  %v1004_v36 = vshrl.u32 %v988_v2, 16  ;;  %v886_v42 = vmul.u32 12, %v870_v25  ;;  %v915_v45 = vshrl.u32 %v899_v30, 16 }
 0x1a4   :  { %v1006_v17 = vshrl.u32 %v990_v44, 16  ;;  %v917_v25 = vshrl.u32 %v901_v57, 16  ;;  %v905_v3 = vadd.s32 %v889_v58, %v2436_v63  ;;  %v890_v9 = vmul.u32 12, %v874_v62 }
 0x1a5   :  { %v944_v20 = vmul.u32 2146121005, %v928_v5  ;;  %v2464_v56 = vxor.u32 %v1004_v36, %v988_v2  ;;  %v902_v7 = vadd.s32 %v886_v42, %v2436_v63  ;;  %v903_v5 = vadd.s32 %v887_v26, %v2436_v63 }
 0x1a6   :  { %v931_v18 = vxor.u32 %v915_v45, %v899_v30  ;;  %v916_v2 = vshrl.u32 %v900_v52, 16  ;;  %v1005_v35 = vshrl.u32 %v989_v6, 16  ;;  %v975_v36 = vxor.u32 %v959_v1, %v943_v22 }
 0x1a7   :  { %v960_v59 = vshrl.u32 %v944_v20, 15  ;;  %v961_v37 = vshrl.u32 %v945_v4, 15  ;;  %v918_v27 = vshrl.u32 %v902_v7, 16  ;;  %v978_v38 = vxor.u32 %v962_v14, %v946_v24 }
 0x1a8   :  { %v919_v40 = vshrl.u32 %v903_v5, 16  ;;  %v904_v42 = vadd.s32 %v888_v16, %v2436_v63  ;;  %v947_v30 = vmul.u32 2146121005, %v931_v18  ;;  %v932_v46 = vxor.u32 %v916_v2, %v900_v52 }
 0x1a9   :  { %v976_v28 = vxor.u32 %v960_v59, %v944_v20  ;;  %v933_v26 = vxor.u32 %v917_v25, %v901_v57  ;;  %v2473_v41 = vxor.u32 %v1006_v17, %v990_v44  ;;  %v921_v45 = vshrl.u32 %v905_v3, 16 }
 0x1aa   :  { %v906_v59 = vadd.s32 %v890_v9, %v2436_v63  ;;  %v2476_v62 = vxor.u32 %v1005_v35, %v989_v6  ;;  %v991_v22 = vmul.u32 2221713035, %v975_v36  ;;  %v934_v24 = vxor.u32 %v918_v27, %v902_v7 }
 0x1ab   :  { %v992_v20 = vmul.u32 2221713035, %v976_v28  ;;  %v994_v1 = vmul.u32 2221713035, %v978_v38  ;;  %v935_v14 = vxor.u32 %v919_v40, %v903_v5  ;;  %v920_v16 = vshrl.u32 %v904_v42, 16 }
 0x1ac   :  { %vm1036_vm5 = vcmp.ge.u32.totalorder %v2464_v56, 0  ;;  %v963_v44 = vshrl.u32 %v947_v30, 15  ;;  %v948_v52 = vmul.u32 2146121005, %v932_v46  ;;  %v949_v57 = vmul.u32 2146121005, %v933_v26 }
 0x1ad   :  { %vm1035_vm6 = vcmp.ge.u32.totalorder %v2468_v12, 0  ;;  %v1008_v63 = vshrl.u32 %v992_v20, 16  ;;  %v2482_v17 = vxor.u32 %v921_v45, %v905_v3  ;;  %v922_v6 = vshrl.u32 %v906_v59, 16 }
 0x1ae   :  { %vm1038_vm7 = vcmp.ge.u32.totalorder %v2473_v41, 0  ;;  %v1007_v7 = vshrl.u32 %v991_v22, 16  ;;  %v950_v2 = vmul.u32 2146121005, %v934_v24  ;;  %vm1037_vm8 = vcmp.ge.u32.totalorder %v2476_v62, 0 }
 0x1af   :  { %v1010_v28 = vshrl.u32 %v994_v1, 16  ;;  %v951_v9 = vmul.u32 2146121005, %v935_v14  ;;  %v2489_v3 = vxor.u32 %v963_v44, %v947_v30  ;;  %v964_v35 = vshrl.u32 %v948_v52, 15 }
 0x1b0   :  { %v965_v36 = vshrl.u32 %v949_v57, 15  ;;  %v2491_v27 = vxor.u32 %v1008_v63, %v992_v20  ;;  %v953_v38 = vmul.u32 2146121005, %v2482_v17  ;;  %v2494_v40 = vxor.u32 %v922_v6, %v906_v59 }
 0x1b1   :  { %v967_v24 = vshrl.u32 %v951_v9, 15  ;;  %v995_v59 = vmul.u32 2221713035, %v2489_v3 }
 0x1b2   :  { %v2506_v44 = vxor.u32 %v965_v36, %v949_v57  ;;  %v969_v17 = vshrl.u32 %v953_v38, 15  ;;  %vm1040_vm9 = vcmp.ge.u32.totalorder %v2491_v27, 0 }
 0x1b4   :  { %v997_v56 = vmul.u32 2221713035, %v2506_v44  ;;  %v2535_v62 = vxor.u32 %v969_v17, %v953_v38 }
 0x20e   :  { %v762_v54 = vpop.xlane.xlu0 %761 }
 0x20f   :  { %2089 = vrcp.f32 %v762_v54  ;;  %v2478_v54 = vxor.u32 %v961_v37, %v945_v4 }
 0x211   :  { %v993_v5 = vmul.u32 2221713035, %v2478_v54  ;;  %v966_v54 = vshrl.u32 %v950_v2, 15 }
 0x212   :  { %v768_v8 = vpop.xlane.xlu1 %767  ;;  %v759_v32 = vpop.xlane.xlu0 %758 }
 0x213   :  { %2091 = vrcp.f32 %v768_v8  ;;  %v2487_v8 = vxor.u32 %v920_v16, %v904_v42  ;;  %v2497_v42 = vxor.u32 %v1007_v7, %v991_v22  ;;  %v2501_v16 = vxor.u32 %v1010_v28, %v994_v1 }
 0x214   :  { %2093 = vrcp.f32 %v759_v32  ;;  %v2516_v57 = vxor.u32 %v966_v54, %v950_v2 }
 0x215   :  { %v952_v14 = vmul.u32 2146121005, %v2487_v8  ;;  %vm1039_vm10 = vcmp.ge.u32.totalorder %v2497_v42, 0  ;;  %vm1042_vm11 = vcmp.ge.u32.totalorder %v2501_v16, 0  ;;  %v1011_v8 = vshrl.u32 %v995_v59, 16 }
 0x216   :  { %v765_v58 = vpop.xlane.xlu1 %764 }
 0x217   :  { %2095 = vrcp.f32 %v765_v58  ;;  %v1009_v58 = vshrl.u32 %v993_v5, 16 }
 0x218   :  { %v774_v18 = vpop.xlane.xlu0 %773 }
 0x219   :  { %2097 = vrcp.f32 %v774_v18  ;;  %v2090_v25 = vpop.eup %2089  ;;  %v2504_v18 = vxor.u32 %v964_v35, %v948_v52  ;;  %v1025_v12 = vxor.u32 %v1009_v58, %v993_v5 }
 0x21a   :  { %v780_v4 = vpop.xlane.xlu1 %779  ;;  %v1052_v45 = vmul.f32 %v2090_v25, %v2337_v55 }
 0x21b   :  { %2099 = vrcp.f32 %v780_v4  ;;  %v968_v4 = vshrl.u32 %v952_v14, 15  ;;  %vm1041_vm12 = vcmp.ge.u32.totalorder %v1025_v12, 0 }
 0x21c   :  { %v771_v32 = vpop.xlane.xlu0 %770  ;;  %v1068_v6 = vsel %vm1036_vm5, %v1052_v45, 0.0  ;;  %v1001_v45 = vmul.u32 2221713035, %v2535_v62 }
 0x21d   :  { %v2092_v37 = vpop.eup %2091  ;;  %2101 = vrcp.f32 %v771_v32  ;;  %v998_v32 = vmul.u32 2221713035, %v2516_v57  ;;  %v984_v36 = vxor.u32 %v968_v4, %v952_v14 }
 0x21e   :  { %v2094_v46 = vpop.eup %2093  ;;  %v777_v26 = vpop.xlane.xlu1 %776  ;;  %v1054_v63 = vmul.f32 %v2092_v37, %v2345_v0  ;;  %v2520_v0 = vxor.u32 %v967_v24, %v951_v9  ;;  %v1017_v27 = vshrl.u32 %v1001_v45, 16 }
 0x21f   :  { %2103 = vrcp.f32 %v777_v26  ;;  %v1051_v30 = vmul.f32 %v2094_v46, %v2341_v61  ;;  %v954_v61 = vmul.u32 2146121005, %v2494_v40  ;;  %v1013_v46 = vshrl.u32 %v997_v56, 16 }
 0x220   :  { %v786_v20 = vpop.xlane.xlu0 %785  ;;  %v1070_v5 = vsel %vm1038_vm7, %v1054_v63, 0.0  ;;  %v999_v35 = vmul.u32 2221713035, %v2520_v0  ;;  %v1014_v24 = vshrl.u32 %v998_v32, 16  ;;  %v1033_v0 = vxor.u32 %v1017_v27, %v1001_v45 }
 0x221   :  { %v2096_v55 = vpop.eup %2095  ;;  %v1067_v22 = vsel %vm1035_vm6, %v1051_v30, 0.0  ;;  %2105 = vrcp.f32 %v786_v20  ;;  %v970_v2 = vshrl.u32 %v954_v61, 15  ;;  %v1027_v30 = vxor.u32 %v1011_v8, %v995_v59 }
 0x222   :  { %1924 = vmatprep.mubr.msk.f32.mxu0 %vm659_vm1, %v1067_v22  ;;  %v792_v1 = vpop.xlane.xlu1 %791  ;;  %v1053_v52 = vmul.f32 %v2096_v55, %v2351_v11  ;;  %v996_v11 = vmul.u32 2221713035, %v2504_v18  ;;  %v1015_v20 = vshrl.u32 %v999_v35, 16  ;;  %v1000_v18 = vmul.u32 2221713035, %v984_v36 }
 0x223   :  { %1925 = vmatmul.mubr.msk.f32.vlgmr.msra.gmra.mrb[8].mxu0 %vm659_vm1, %v1068_v6  ;;  %v2098_v7 = vpop.eup %2097  ;;  %2107 = vrcp.f32 %v792_v1  ;;  %v1029_v22 = vxor.u32 %v1013_v46, %v997_v56  ;;  %vm1043_vm13 = vcmp.ge.u32.totalorder %v1027_v30, 0  ;;  %vm1049_vm3 = vcmp.ge.u32.totalorder %v1033_v0, 0 }
 0x224   :  { %v783_v25 = vpop.xlane.xlu0 %782  ;;  %v1069_v28 = vsel %vm1037_vm8, %v1053_v52, 0.0  ;;  %2025 = vmatpush3.bf16.msk.msra.mxu0 %vm2407_vm4, %v2166_v10  ;;  %v1056_v3 = vmul.f32 %v2098_v7, %v2359_v19  ;;  %v1012_v40 = vshrl.u32 %v996_v11, 16  ;;  %v1016_v6 = vshrl.u32 %v1000_v18, 16 }
 0x225   :  { %2109 = vrcp.f32 %v783_v25  ;;  %1931 = vmatprep.mubr.msk.f32.mxu1 %vm659_vm1, %v1069_v28  ;;  %2034 = vmatprep.subr.msk.bf16.mxu0 %vm2407_vm4, %v2202_v21  ;;  %v2100_v9 = vpop.eup %2099  ;;  %vm1045_vm15 = vcmp.ge.u32.totalorder %v1029_v22, 0 }
 0x226   :  { %1932 = vmatmul.mubr.msk.f32.vlgmr.msra.gmra.mrb[8].mxu1 %vm659_vm1, %v1070_v5  ;;  %v789_v10 = vpop.xlane.xlu1 %788  ;;  %v1058_v19 = vmul.f32 %v2100_v9, %v2355_v15  ;;  %v1072_v14 = vsel %vm1040_vm9, %v1056_v3, 0.0  ;;  %v1028_v42 = vxor.u32 %v1012_v40, %v996_v11  ;;  %v1032_v25 = vxor.u32 %v1016_v6, %v1000_v18 }
 0x227   :  { %v2102_v41 = vpop.eup %2101  ;;  %2111 = vrcp.f32 %v789_v10  ;;  %2031 = vmatpush3.bf16.msk.msra.mxu1 %vm2407_vm4, %v2176_v13  ;;  %v986_v13 = vxor.u32 %v970_v2, %v954_v61  ;;  %v1030_v61 = vxor.u32 %v1014_v24, %v998_v32 }
 0x228   :  { %v795_v37 = vpop.xlane.xlu0 %794  ;;  %v1055_v38 = vmul.f32 %v2102_v41, %v2369_v34  ;;  %2040 = vmatprep.subr.msk.bf16.mxu1 %vm2407_vm4, %v2207_v23  ;;  %vm1044_vm14 = vcmp.ge.u32.totalorder %v1028_v42, 0  ;;  %vm1048_vm5 = vcmp.ge.u32.totalorder %v1032_v25, 0 }
 0x229   :  { %v2104_v26 = vpop.eup %2103  ;;  %2113 = vrcp.f32 %v795_v37  ;;  %v1002_v59 = vmul.u32 2221713035, %v986_v13  ;;  %vm1046_vm0 = vcmp.ge.u32.totalorder %v1030_v61, 0 }
 0x22a   :  { %v801_v58 = vpop.xlane.xlu1 %800  ;;  %v1071_v54 = vsel %vm1039_vm10, %v1055_v38, 0.0  ;;  %v1057_v34 = vmul.f32 %v2104_v26, %v2365_v29  ;;  %v1074_v29 = vsel %vm1042_vm11, %v1058_v19, 0.0 }
 0x22b   :  { %2115 = vrcp.f32 %v801_v58  ;;  %1938 = vmatprep.mubr.msk.f32.mxu0 %vm659_vm1, %v1071_v54  ;;  %v2106_v15 = vpop.eup %2105  ;;  %v1018_v4 = vshrl.u32 %v1002_v59, 16 }
 0x22c   :  { %1939 = vmatmul.mubr.msk.f32.vlgmr.msra.gmra.mrb[10].mxu0 %vm659_vm1, %v1072_v14  ;;  %v798_v44 = vpop.xlane.xlu0 %797  ;;  %v1073_v55 = vsel %vm1041_vm12, %v1057_v34, 0.0  ;;  %v1060_v16 = vmul.f32 %v2106_v15, %v2379_v43 }
 0x22d   :  { %2117 = vrcp.f32 %v798_v44  ;;  %1945 = vmatprep.mubr.msk.f32.mxu1 %vm659_vm1, %v1073_v55  ;;  %2037 = vmatpush3.bf16.msk.msra.mxu0 %vm2407_vm4, %v2202_v21  ;;  %v2108_v63 = vpop.eup %2107  ;;  %v1031_v21 = vxor.u32 %v1015_v20, %v999_v35 }
 0x22e   :  { %1946 = vmatmul.mubr.msk.f32.vlgmr.msra.gmra.mrb[10].mxu1 %vm659_vm1, %v1074_v29  ;;  %v804_v17 = vpop.xlane.xlu1 %803  ;;  %2046 = vmatprep.subr.msk.bf16.mxu0 %vm2407_vm4, %v2234_v31  ;;  %v1062_v12 = vmul.f32 %v2108_v63, %v2375_v39 }
 0x22f   :  { %v2110_v1 = vpop.eup %2109  ;;  %2119 = vrcp.f32 %v804_v17  ;;  %2043 = vmatpush3.bf16.msk.msra.mxu1 %vm2407_vm4, %v2207_v23  ;;  %vm1047_vm2 = vcmp.ge.u32.totalorder %v1031_v21, 0 }
 0x230   :  { %v1059_v52 = vmul.f32 %v2110_v1, %v2387_v49  ;;  %2052 = vmatprep.subr.msk.bf16.mxu1 %vm2407_vm4, %v2239_v33  ;;  %v1076_v49 = vsel %vm1044_vm14, %v1060_v16, 0.0  ;;  %v1078_v39 = vsel %vm1046_vm0, %v1062_v12, 0.0 }
 0x231   :  { %v2112_v57 = vpop.eup %2111 }
 0x232   :  { %v1075_v43 = vsel %vm1043_vm13, %v1059_v52, 0.0  ;;  %v1061_v7 = vmul.f32 %v2112_v57, %v2383_v48  ;;  %v1034_v48 = vxor.u32 %v1018_v4, %v1002_v59 }
 0x233   :  { %v2114_v23 = vpop.eup %2113  ;;  %1952 = vmatprep.mubr.msk.f32.mxu0 %vm659_vm1, %v1075_v43 }
 0x234   :  { %1953 = vmatmul.mubr.msk.f32.vlgmr.msra.gmra.mrb[12].mxu0 %vm659_vm1, %v1076_v49  ;;  %v1077_v28 = vsel %vm1045_vm15, %v1061_v7, 0.0  ;;  %v1063_v11 = vmul.f32 %v2114_v23, %v2391_v50  ;;  %vm1050_vm6 = vcmp.ge.u32.totalorder %v1034_v48, 0 }
 0x235   :  { %v2116_v56 = vpop.eup %2115  ;;  %1959 = vmatprep.mubr.msk.f32.mxu1 %vm659_vm1, %v1077_v28  ;;  %2049 = vmatpush3.bf16.msk.msra.mxu0 %vm2407_vm4, %v2234_v31 }
 0x236   :  { %1960 = vmatmul.mubr.msk.f32.vlgmr.msra.gmra.mrb[12].mxu1 %vm659_vm1, %v1078_v39  ;;  %v1079_v5 = vsel %vm1047_vm2, %v1063_v11, 0.0  ;;  %v1065_v62 = vmul.f32 %v2116_v56, %v2395_v51 }
 0x237   :  { %v2118_v2 = vpop.eup %2117  ;;  %1966 = vmatprep.mubr.msk.f32.mxu0 %vm659_vm1, %v1079_v5  ;;  %2055 = vmatpush3.bf16.msk.msra.mxu1 %vm2407_vm4, %v2239_v33 }
 0x238   :  { %v1081_v50 = vsel %vm1049_vm3, %v1065_v62, 0.0  ;;  %v1064_v9 = vmul.f32 %v2118_v2, %v2399_v53 }
 0x239   :  { %v2120_v10 = vpop.eup %2119  ;;  %1973 = vmatprep.mubr.msk.f32.mxu1 %vm659_vm1, %v1081_v50 }
 0x23a   :  { %v1080_v31 = vsel %vm1048_vm5, %v1064_v9, 0.0  ;;  %v1066_v8 = vmul.f32 %v2120_v10, %v2403_v47 }
 0x23b   :  { %1967 = vmatmul.mubr.msk.f32.vlgmr.msra.gmra.mrb[14].mxu0 %vm659_vm1, %v1080_v31 }
 0x23c   :  { %v1082_v51 = vsel %vm1050_vm6, %v1066_v8, 0.0 }
 0x23d   :  { %1974 = vmatmul.mubr.msk.f32.vlgmr.msra.gmra.mrb[14].mxu1 %vm659_vm1, %v1082_v51 }
 0x2f6   :  { %v1926_v32 = vpop.f32.mrb[8].mxu0 }
 0x2f7   :  { %1757 = vst [vmem:[%s2649_s2 + $0x8] sm:$0xf] %v1926_v32  ;;  %v1159_v33 = vpop.f32.mrb[9].mxu0 }
 0x2f8   :  { %1756 = vst [vmem:[%s2649_s2] sm:$0xff] %v1159_v33 }
 0x2f9   :  { %v1933_v53 = vpop.f32.mrb[8].mxu1 }
 0x2fa   :  { %1759 = vst [vmem:[%s2649_s2 + $0x18] sm:$0xf] %v1933_v53  ;;  %v1243_v47 = vpop.f32.mrb[9].mxu1 }
 0x2fb   :  { %1758 = vst [vmem:[%s2649_s2 + $0x10] sm:$0xff] %v1243_v47 }
 0x2ff   :  { %v1940_v60 = vpop.f32.mrb[10].mxu0 }
 0x300   :  { %1761 = vst [vmem:[%s2649_s2 + $0x28] sm:$0xf] %v1940_v60  ;;  %v1327_v41 = vpop.f32.mrb[11].mxu0 }
 0x301   :  { %1760 = vst [vmem:[%s2649_s2 + $0x20] sm:$0xff] %v1327_v41  ;;  %v1947_v3 = vpop.f32.mrb[10].mxu1 }
 0x302   :  { %1763 = vst [vmem:[%s2649_s2 + $0x38] sm:$0xf] %v1947_v3  ;;  %v1411_v35 = vpop.f32.mrb[11].mxu1 }
 0x303   :  { %1762 = vst [vmem:[%s2649_s2 + $0x30] sm:$0xff] %v1411_v35 }
 0x307   :  { %v1954_v36 = vpop.f32.mrb[12].mxu0 }
 0x308   :  { %1765 = vst [vmem:[%s2649_s2 + $0x48] sm:$0xf] %v1954_v36  ;;  %v1495_v37 = vpop.f32.mrb[13].mxu0 }
 0x309   :  { %1764 = vst [vmem:[%s2649_s2 + $0x40] sm:$0xff] %v1495_v37  ;;  %v1961_v38 = vpop.f32.mrb[12].mxu1 }
 0x30a   :  { %1767 = vst [vmem:[%s2649_s2 + $0x58] sm:$0xf] %v1961_v38  ;;  %v1579_v40 = vpop.f32.mrb[13].mxu1 }
 0x30b   :  { %1766 = vst [vmem:[%s2649_s2 + $0x50] sm:$0xff] %v1579_v40 }
 0x30e   :  { %v1968_v46 = vpop.f32.mrb[14].mxu0 }
 0x30f   :  { %1769 = vst [vmem:[%s2649_s2 + $0x68] sm:$0xf] %v1968_v46  ;;  %v1663_v26 = vpop.f32.mrb[15].mxu0 }
 0x310   :  { %1768 = vst [vmem:[%s2649_s2 + $0x60] sm:$0xff] %v1663_v26  ;;  %v1975_v19 = vpop.f32.mrb[14].mxu1 }
 0x311   :  { %1771 = vst [vmem:[%s2649_s2 + $0x78] sm:$0xf] %v1975_v19  ;;  %v1747_v45 = vpop.f32.mrb[15].mxu1 }
 0x312   :  { %1770 = vst [vmem:[%s2649_s2 + $0x70] sm:$0xff] %v1747_v45 }

</bundles_post_ra>
